<compile_context>
chip_gen: v7x
topology: tpu7x:2x2x1
jax: 0.10.0
libtpu: 0.0.40
codegen_flags: <defaults>
</compile_context>

<pallas_src>
import jax
import jax.numpy as jnp
from jax.experimental import pallas as pl
from jax.experimental.pallas import tpu as pltpu


def _dwt_kernel(x_ref, a_ref, b_ref, o_ref):
    """x_ref: (1, C_t, TH, 2W) with each row stored as [even src row | odd src row].
    a_ref/b_ref: (W, Wh) column-selection matrices (entries in {0, +-0.5}).
    o_ref: (1, 4, C_t, TH, Wh) band-major output block (LL, HL, LH, HH)."""
    f32 = jnp.float32
    _, c_t, th, two_w = x_ref.shape
    w = two_w // 2
    wh = a_ref.shape[1]

    x = x_ref[0].astype(f32)            # (C_t, TH, 2W) -- single contiguous read
    xe = x[:, :, :w]                    # even source rows   (static lane slice)
    xo = x[:, :, w:]                    # odd  source rows

    # Row butterfly on the VPU; the 0.5 scale lives in the selection matrices.
    m = c_t * th
    s = (xe + xo).reshape(m, w)         # feeds LL / HL
    d = (xo - xe).reshape(m, w)         # feeds LH / HH

    a = a_ref[...].astype(f32)          # col (even+odd) * 0.5
    bm = b_ref[...].astype(f32)         # col (odd-even) * 0.5
    hi = jax.lax.Precision.HIGHEST      # exact-ish f32 MXU path (2 terms/output)

    ll = jnp.dot(s, a, precision=hi, preferred_element_type=f32)   # x1+x2+x3+x4
    hl = jnp.dot(s, bm, precision=hi, preferred_element_type=f32)  # -x1-x2+x3+x4
    lh = jnp.dot(d, a, precision=hi, preferred_element_type=f32)   # -x1+x2-x3+x4
    hh = jnp.dot(d, bm, precision=hi, preferred_element_type=f32)  # x1-x2-x3+x4

    odt = o_ref.dtype
    o_ref[0, 0] = ll.reshape(c_t, th, wh).astype(odt)
    o_ref[0, 1] = hl.reshape(c_t, th, wh).astype(odt)
    o_ref[0, 2] = lh.reshape(c_t, th, wh).astype(odt)
    o_ref[0, 3] = hh.reshape(c_t, th, wh).astype(odt)


def _auto_budget():
    """(per-step input-block byte budget, scoped vmem_limit_bytes), per chip gen."""
    phys = 64 * 2**20
    try:
        info = pltpu.get_tpu_info()
        phys = int(getattr(info, "vmem_capacity_bytes", phys) or phys)
    except Exception:
        pass
    # v5e/v6e: 128 MiB phys -> 64 MiB scoped; v7x: 64 MiB phys -> 32 MiB scoped.
    vmem_limit = int(min(96 * 2**20, max(24 * 2**20, phys // 2)))
    # Input block ~= output block bytes; both double-buffered + f32 intermediates
    # => keep one block to ~1/8 of the scoped limit, with a 1 MiB tile floor.
    step = int(min(16 * 2**20, max(1 * 2**20, vmem_limit // 8)))
    return step, vmem_limit


def _choose_tiles(C, Hh, W, itemsize, max_step_bytes):
    """Pick (C_t, TH). Prefer full spatial extent per channel (longest contiguous
    HBM runs on both input and band-major output DMA); shrink channels first,
    then rows in multiples of 8 (keeps in-kernel reshapes layout-free)."""
    bytes_per_chan = Hh * 2 * W * itemsize
    if C * bytes_per_chan <= max_step_bytes:
        return C, Hh                              # whole (C, Hh) slab per batch elem
    if bytes_per_chan <= max_step_bytes:
        c_t = max(1, max_step_bytes // bytes_per_chan)
        while c_t > 1 and C % c_t:                # prefer a divisor -> no padded steps
            c_t -= 1
        return int(c_t), Hh
    rows_cap = max(1, max_step_bytes // (2 * W * itemsize))
    if Hh <= 8 or rows_cap >= Hh:
        return 1, Hh
    th = max(8, (rows_cap // 8) * 8)
    while th > 8 and Hh % th:                     # prefer a multiple-of-8 divisor
        th -= 8
    return 1, int(min(th, Hh))


def dwt_forward(x, max_step_bytes=None):
    """Pallas implementation of DWT.forward. x: (B, C, H, W), H and W even."""
    B, C, H, W = x.shape
    assert H % 2 == 0 and W % 2 == 0, "H and W must be even"
    Hh, Wh = H // 2, W // 2

    auto_step, vmem_limit = _auto_budget()
    step = auto_step if max_step_bytes is None else int(max_step_bytes)

    # Free metadata reshape: source row r -> (t=r//2, parity); the last dim now
    # holds [even row | odd row] so the kernel reads x once, contiguously.
    xp = x.reshape(B, C, Hh, 2 * W)

    # Column de-interleave + 0.5 scale as exact selection matrices (MXU is idle).
    j = jnp.arange(Wh)
    a = jnp.zeros((W, Wh), jnp.float32).at[2 * j, j].set(0.5).at[2 * j + 1, j].set(0.5)
    bm = jnp.zeros((W, Wh), jnp.float32).at[2 * j, j].set(-0.5).at[2 * j + 1, j].set(0.5)

    C_t, TH = _choose_tiles(C, Hh, W, x.dtype.itemsize, step)
    grid = (B, pl.cdiv(C, C_t), pl.cdiv(Hh, TH))

    x_spec = pl.BlockSpec((1, C_t, TH, 2 * W), lambda b, c, r: (b, c, r, 0))
    m_spec = pl.BlockSpec((W, Wh), lambda b, c, r: (0, 0))   # resident, fetched once
    out_spec = pl.BlockSpec((1, 4, C_t, TH, Wh), lambda b, c, r: (b, 0, c, r, 0))

    out5 = pl.pallas_call(
        _dwt_kernel,
        out_shape=jax.ShapeDtypeStruct((B, 4, C, Hh, Wh), x.dtype),
        grid_spec=pltpu.PrefetchScalarGridSpec(
            num_scalar_prefetch=0,
            grid=grid,
            in_specs=[x_spec, m_spec, m_spec],
            out_specs=out_spec,
        ),
        compiler_params=pltpu.CompilerParams(
            dimension_semantics=("parallel", "parallel", "parallel"),
            vmem_limit_bytes=vmem_limit,
        ),
    )(xp, a, bm)

    # (B, 4, C, Hh, Wh) -> (B, 4C, Hh, Wh): leading-dim merge (free); band-major
    # order matches torch.cat((LL, HL, LH, HH), dim=1).
    return out5.reshape(B, 4 * C, Hh, Wh)


def dwt_reference(x):
    """Pure-JAX mirror of the PyTorch dwt_init, for verification."""
    x01 = x[:, :, 0::2, :] / 2
    x02 = x[:, :, 1::2, :] / 2
    x1 = x01[:, :, :, 0::2]
    x2 = x02[:, :, :, 0::2]
    x3 = x01[:, :, :, 1::2]
    x4 = x02[:, :, :, 1::2]
    x_LL = x1 + x2 + x3 + x4
    x_HL = -x1 - x2 + x3 + x4
    x_LH = -x1 + x2 - x3 + x4
    x_HH = x1 - x2 - x3 + x4
    return jnp.concatenate((x_LL, x_HL, x_LH, x_HH), axis=1)


if __name__ == "__main__":
    key = jax.random.PRNGKey(0)
    k1, k2, k3 = jax.random.split(key, 3)

    fwd = jax.jit(dwt_forward, static_argnums=1)

    # Primary small test (NCHW image batch), default auto-sized tiles.
    B, C, H, W = 2, 4, 16, 16
    x = jax.random.normal(k1, (B, C, H, W), dtype=jnp.float32)
    out = jax.block_until_ready(fwd(x, None))
    ref = dwt_reference(x)
    assert out.shape == (B, 4 * C, H // 2, W // 2), out.shape
    assert jnp.allclose(out, ref, atol=1e-5, rtol=1e-5), "mismatch vs reference (small)"

    # Force the channel-tiled path with a tiny explicit per-step budget.
    B2, C2, H2, W2 = 2, 4, 32, 256
    x2 = jax.random.normal(k2, (B2, C2, H2, W2), dtype=jnp.float32)
    out2 = jax.block_until_ready(fwd(x2, 64 * 1024))
    ref2 = dwt_reference(x2)
    assert out2.shape == (B2, 4 * C2, H2 // 2, W2 // 2), out2.shape
    assert jnp.allclose(out2, ref2, atol=1e-5, rtol=1e-5), "mismatch vs reference (C-tiled)"

    # Force the row-tiled path (single channel per step, TH < Hh).
    x3 = jax.random.normal(k3, (B2, C2, H2, W2), dtype=jnp.float32)
    out3 = jax.block_until_ready(fwd(x3, 16 * 1024))
    ref3 = dwt_reference(x3)
    assert out3.shape == (B2, 4 * C2, H2 // 2, W2 // 2), out3.shape
    assert jnp.allclose(out3, ref3, atol=1e-5, rtol=1e-5), "mismatch vs reference (row-tiled)"

    print("KERNEL_OK")
</pallas_src>

<mosaic_0001>
module attributes {stable_mosaic.version = 11 : i64} {
  func.func @_dwt_kernel(%arg0: i32, %arg1: i32, %arg2: i32, %arg3: memref<1x4x8x32xf32, #tpu.memory_space<vmem>>, %arg4: memref<16x8xf32, #tpu.memory_space<vmem>>, %arg5: memref<16x8xf32, #tpu.memory_space<vmem>>, %arg6: memref<1x4x4x8x8xf32, #tpu.memory_space<vmem>>) attributes {dimension_semantics = [#tpu.dimension_semantics<parallel>, #tpu.dimension_semantics<parallel>, #tpu.dimension_semantics<parallel>], iteration_bounds = array<i64: 2, 1, 1>, scalar_prefetch = 0 : i64, scratch_operands = 0 : i64, tpu.core_type = #tpu.core_type<tc>, window_params = [{transform_indices = @transform_0, window_bounds = array<i64: 1, 4, 8, 32>}, {pipeline_mode = #tpu.pipeline_mode<synchronous>, transform_indices = @transform_1, window_bounds = array<i64: 16, 8>}, {pipeline_mode = #tpu.pipeline_mode<synchronous>, transform_indices = @transform_2, window_bounds = array<i64: 16, 8>}, {transform_indices = @transform_3, window_bounds = array<i64: 1, 4, 4, 8, 8>}]} {
    %c0 = arith.constant 0 : index
    %c0_0 = arith.constant 0 : index
    %c0_1 = arith.constant 0 : index
    %c0_2 = arith.constant 0 : index
    %0 = vector.load %arg3[%c0, %c0_0, %c0_1, %c0_2] : memref<1x4x8x32xf32, #tpu.memory_space<vmem>>, vector<1x4x8x32xf32>
    %1 = vector.shape_cast %0 : vector<1x4x8x32xf32> to vector<4x8x32xf32>
    %2 = vector.extract_strided_slice %1 {offsets = [0, 0, 0], sizes = [4, 8, 16], strides = [1, 1, 1]} : vector<4x8x32xf32> to vector<4x8x16xf32>
    %3 = vector.extract_strided_slice %1 {offsets = [0, 0, 16], sizes = [4, 8, 16], strides = [1, 1, 1]} : vector<4x8x32xf32> to vector<4x8x16xf32>
    %4 = arith.addf %2, %3 : vector<4x8x16xf32>
    %5 = vector.shape_cast %4 : vector<4x8x16xf32> to vector<32x16xf32>
    %6 = arith.subf %3, %2 : vector<4x8x16xf32>
    %7 = vector.shape_cast %6 : vector<4x8x16xf32> to vector<32x16xf32>
    %c0_3 = arith.constant 0 : index
    %c0_4 = arith.constant 0 : index
    %8 = vector.load %arg4[%c0_3, %c0_4] : memref<16x8xf32, #tpu.memory_space<vmem>>, vector<16x8xf32>
    %c0_5 = arith.constant 0 : index
    %c0_6 = arith.constant 0 : index
    %9 = vector.load %arg5[%c0_5, %c0_6] : memref<16x8xf32, #tpu.memory_space<vmem>>, vector<16x8xf32>
    %cst = arith.constant dense<0.000000e+00> : vector<32x8xf32>
    %10 = tpu.matmul %5, %8, %cst {dimension_numbers = #tpu.dot_dimension_numbers<[1], [0], [0], [1], [0, 0, 1, 1], [], []>, precision = #tpu.contract_precision<fp32>} : vector<32x16xf32>, vector<16x8xf32>, vector<32x8xf32> -> vector<32x8xf32>
    %cst_7 = arith.constant dense<0.000000e+00> : vector<32x8xf32>
    %11 = tpu.matmul %5, %9, %cst_7 {dimension_numbers = #tpu.dot_dimension_numbers<[1], [0], [0], [1], [0, 0, 1, 1], [], []>, precision = #tpu.contract_precision<fp32>} : vector<32x16xf32>, vector<16x8xf32>, vector<32x8xf32> -> vector<32x8xf32>
    %cst_8 = arith.constant dense<0.000000e+00> : vector<32x8xf32>
    %12 = tpu.matmul %7, %8, %cst_8 {dimension_numbers = #tpu.dot_dimension_numbers<[1], [0], [0], [1], [0, 0, 1, 1], [], []>, precision = #tpu.contract_precision<fp32>} : vector<32x16xf32>, vector<16x8xf32>, vector<32x8xf32> -> vector<32x8xf32>
    %cst_9 = arith.constant dense<0.000000e+00> : vector<32x8xf32>
    %13 = tpu.matmul %7, %9, %cst_9 {dimension_numbers = #tpu.dot_dimension_numbers<[1], [0], [0], [1], [0, 0, 1, 1], [], []>, precision = #tpu.contract_precision<fp32>} : vector<32x16xf32>, vector<16x8xf32>, vector<32x8xf32> -> vector<32x8xf32>
    %14 = vector.shape_cast %10 : vector<32x8xf32> to vector<4x8x8xf32>
    %c0_10 = arith.constant 0 : index
    %c0_11 = arith.constant 0 : index
    %c0_12 = arith.constant 0 : index
    %c0_13 = arith.constant 0 : index
    %c0_14 = arith.constant 0 : index
    %15 = vector.load %arg6[%c0_10, %c0_11, %c0_12, %c0_13, %c0_14] : memref<1x4x4x8x8xf32, #tpu.memory_space<vmem>>, vector<1x1x4x8x8xf32>
    %16 = vector.shape_cast %15 : vector<1x1x4x8x8xf32> to vector<4x8x8xf32>
    %17 = vector.shape_cast %14 : vector<4x8x8xf32> to vector<1x1x4x8x8xf32>
    tpu.vector_store %arg6[%c0_10, %c0_11, %c0_12, %c0_13, %c0_14], %17 {strides = array<i32>} : memref<1x4x4x8x8xf32, #tpu.memory_space<vmem>>, vector<1x1x4x8x8xf32>,
    %18 = vector.shape_cast %11 : vector<32x8xf32> to vector<4x8x8xf32>
    %c0_15 = arith.constant 0 : index
    %c1 = arith.constant 1 : index
    %c0_16 = arith.constant 0 : index
    %c0_17 = arith.constant 0 : index
    %c0_18 = arith.constant 0 : index
    %19 = vector.load %arg6[%c0_15, %c1, %c0_16, %c0_17, %c0_18] : memref<1x4x4x8x8xf32, #tpu.memory_space<vmem>>, vector<1x1x4x8x8xf32>
    %20 = vector.shape_cast %19 : vector<1x1x4x8x8xf32> to vector<4x8x8xf32>
    %21 = vector.shape_cast %18 : vector<4x8x8xf32> to vector<1x1x4x8x8xf32>
    tpu.vector_store %arg6[%c0_15, %c1, %c0_16, %c0_17, %c0_18], %21 {strides = array<i32>} : memref<1x4x4x8x8xf32, #tpu.memory_space<vmem>>, vector<1x1x4x8x8xf32>,
    %22 = vector.shape_cast %12 : vector<32x8xf32> to vector<4x8x8xf32>
    %c0_19 = arith.constant 0 : index
    %c2 = arith.constant 2 : index
    %c0_20 = arith.constant 0 : index
    %c0_21 = arith.constant 0 : index
    %c0_22 = arith.constant 0 : index
    %23 = vector.load %arg6[%c0_19, %c2, %c0_20, %c0_21, %c0_22] : memref<1x4x4x8x8xf32, #tpu.memory_space<vmem>>, vector<1x1x4x8x8xf32>
    %24 = vector.shape_cast %23 : vector<1x1x4x8x8xf32> to vector<4x8x8xf32>
    %25 = vector.shape_cast %22 : vector<4x8x8xf32> to vector<1x1x4x8x8xf32>
    tpu.vector_store %arg6[%c0_19, %c2, %c0_20, %c0_21, %c0_22], %25 {strides = array<i32>} : memref<1x4x4x8x8xf32, #tpu.memory_space<vmem>>, vector<1x1x4x8x8xf32>,
    %26 = vector.shape_cast %13 : vector<32x8xf32> to vector<4x8x8xf32>
    %c0_23 = arith.constant 0 : index
    %c3 = arith.constant 3 : index
    %c0_24 = arith.constant 0 : index
    %c0_25 = arith.constant 0 : index
    %c0_26 = arith.constant 0 : index
    %27 = vector.load %arg6[%c0_23, %c3, %c0_24, %c0_25, %c0_26] : memref<1x4x4x8x8xf32, #tpu.memory_space<vmem>>, vector<1x1x4x8x8xf32>
    %28 = vector.shape_cast %27 : vector<1x1x4x8x8xf32> to vector<4x8x8xf32>
    %29 = vector.shape_cast %26 : vector<4x8x8xf32> to vector<1x1x4x8x8xf32>
    tpu.vector_store %arg6[%c0_23, %c3, %c0_24, %c0_25, %c0_26], %29 {strides = array<i32>} : memref<1x4x4x8x8xf32, #tpu.memory_space<vmem>>, vector<1x1x4x8x8xf32>,
    return
  }
  func.func @transform_0(%arg0: i32, %arg1: i32, %arg2: i32) -> (i32, i32, i32, i32) {
    %c0_i32 = arith.constant 0 : i32
    %c0_i32_0 = arith.constant 0 : i32
    return %arg0, %arg1, %arg2, %c0_i32 : i32, i32, i32, i32
  }
  func.func @transform_1(%arg0: i32, %arg1: i32, %arg2: i32) -> (i32, i32) {
    %c0_i32 = arith.constant 0 : i32
    %c0_i32_0 = arith.constant 0 : i32
    %c0_i32_1 = arith.constant 0 : i32
    return %c0_i32, %c0_i32_0 : i32, i32
  }
  func.func @transform_2(%arg0: i32, %arg1: i32, %arg2: i32) -> (i32, i32) {
    %c0_i32 = arith.constant 0 : i32
    %c0_i32_0 = arith.constant 0 : i32
    %c0_i32_1 = arith.constant 0 : i32
    return %c0_i32, %c0_i32_0 : i32, i32
  }
  func.func @transform_3(%arg0: i32, %arg1: i32, %arg2: i32) -> (i32, i32, i32, i32, i32) {
    %c0_i32 = arith.constant 0 : i32
    %c0_i32_0 = arith.constant 0 : i32
    %c0_i32_1 = arith.constant 0 : i32
    return %arg0, %c0_i32, %arg1, %arg2, %c0_i32_0 : i32, i32, i32, i32, i32
  }
}

</mosaic_0001>

<bundles_post_ra>
// kernel: dwt_forward.1
= control target key start
LH: loop header
LB: loop body
LE: loop exit
PB: predicated region body
PF: predicated region fallthrough
CT: control target
= control target key end

     0   :  { %s3445_s12 = smov 0   ;;  %s3447_s13 = smov 0   ;;  %s3698_s0 = inlined_call_operand.vmem [shape: f32[2,4,8,32], index: 0, kind: input, shape index: {}]   ;;  %s3699_s1 = inlined_call_operand.vmem [shape: f32[16,8], index: 1, kind: input, shape index: {}]   ;;  %s3700_s2 = inlined_call_operand.vmem [shape: f32[16,8], index: 2, kind: input, shape index: {}]   ;;  %s3701_s3 = inlined_call_operand.vmem [shape: f32[2,4,4,8,8], index: 3, kind: output, shape index: {}]  }
   0x1   :  { %s3449_s14 = smov 0  }
   0x2 LB: > { %s32_s15 = sadd.s32 1, %s3417_s13  ;;  %p2792_p0 = scmp.ge.s32.totalorder %s3421_s14, 1  ;;  %s3421_s14 = sphi %s3449_s14, %s13_s14   ;;  %s3417_s13 = sphi %s3447_s13, %s3703_s13   ;;  %s3413_s12 = sphi %s3445_s12, %s3702_s12  }
   0x3   : > { %p34_p1 = scmp.ge.s32.totalorder %s32_s15, 2  ;;  %p172_p2 = scmp.lt.s32.totalorder %s3421_s14, 3 }
   0x5   : > { %s3705_s15 = smov (%p34_p1, %s32_s15), 0  ;;  %p173_p3 = pnand %p2792_p0, %p172_p2 }
   0x6   : > { %p211_p4 = scmp.lt.s32.totalorder (!%p173_p3), %s3413_s12, 1  ;;  %s3423_s20 = smov (!%p173_p3), 16   ;;  %v276_v4 = vld [vmem:[%s3699_s1] sm:$0xff] (!%p173_p3)  ;;  %v277_v5 = vld [vmem:[%s3699_s1 + $0x8] sm:$0xff] (!%p173_p3)  ;;  %vm280_vm0 = vcmask (!%p173_p3), 130048   ;;  %vm2665_vm1 = vcmask (!%p173_p3), 64512  }
   0x7   : > { %176 = sbr.rel (%p173_p3) target bundleno = 523 (0x20b), region = 32  ;;  %v294_v6 = vand.u32 (!%p173_p3), 4294901760, %v276_v4  ;;  %v297_v7 = vand.u32 (!%p173_p3), 4294901760, %v277_v5  ;;  %v278_v8 = vld [vmem:[%s3700_s2] sm:$0xff] (!%p173_p3)  ;;  %v279_v9 = vld [vmem:[%s3700_s2 + $0x8] sm:$0xff] (!%p173_p3)  ;;  %s3424_s29 = smov (!%p173_p3), 112  }
   0x8   : > { %v882_v10 = vand.u32 (!%p173_p3), 4294901760, %v278_v8  ;;  %v885_v11 = vand.u32 (!%p173_p3), 4294901760, %v279_v9 }
   0x9   : > { %v3490_v12 = vpack.c.bf16 (!%p173_p3), %v297_v7, %v294_v6  ;;  %v402_v14 = vsub.f32 (!%p173_p3), %v276_v4, %v294_v6  ;;  %v409_v15 = vsub.f32 (!%p173_p3), %v277_v5, %v297_v7 }
   0xa   : > { %v3495_v13 = vpack.c.bf16 (!%p173_p3), %v885_v11, %v882_v10  ;;  %v990_v16 = vsub.f32 (!%p173_p3), %v278_v8, %v882_v10  ;;  %v997_v17 = vsub.f32 (!%p173_p3), %v279_v9, %v885_v11 }
   0xb   : > { %3198 = vmatprep.subr.bf16.mxu0 (!%p173_p3), %v3490_v12  ;;  %v403_v18 = vand.u32 (!%p173_p3), 4294901760, %v402_v14  ;;  %v410_v19 = vand.u32 (!%p173_p3), 4294901760, %v409_v15  ;;  %v3509_v32 = vpack.c.bf16 (!%p173_p3), %v409_v15, %v402_v14 }
   0xc   : > { %3222 = vmatprep.subr.bf16.mxu1 (!%p173_p3), %v3495_v13  ;;  %3200 = vmatpush3.bf16.msra.mxu0 (!%p173_p3), %v3490_v12  ;;  %v991_v20 = vand.u32 (!%p173_p3), 4294901760, %v990_v16  ;;  %v998_v21 = vand.u32 (!%p173_p3), 4294901760, %v997_v17  ;;  %v3511_v33 = vpack.c.bf16 (!%p173_p3), %v997_v17, %v990_v16 }
   0xd   : > { %3224 = vmatpush3.bf16.msra.mxu1 (!%p173_p3), %v3495_v13  ;;  %v404_v22 = vsub.f32 (!%p173_p3), %v402_v14, %v403_v18  ;;  %v411_v23 = vsub.f32 (!%p173_p3), %v409_v15, %v410_v19  ;;  %v3515_v34 = vpack.c.bf16 (!%p173_p3), %v410_v19, %v403_v18 }
   0xe   : > { %s3707_s12 = smov (!%p211_p4, %s3413_s12), 1  ;;  %v992_v24 = vsub.f32 %v990_v16, %v991_v20  ;;  %v999_v25 = vsub.f32 %v997_v17, %v998_v21  ;;  %v3517_v35 = vpack.c.bf16 %v998_v21, %v991_v20 }
   0xf   : > { %s2811_s16 = sshll.u32 %s3707_s12, 5  ;;  %v405_v26 = vand.u32 4294901760, %v404_v22  ;;  %v412_v27 = vand.u32 4294901760, %v411_v23  ;;  %s2812_s30 = sshll.u32 %s3707_s12, 7 }
  0x10   : > { %s221_s19 = scalar_lea.vmem %s3698_s0, %s2811_s16  ;;  %v993_v28 = vand.u32 4294901760, %v992_v24  ;;  %v1000_v29 = vand.u32 4294901760, %v999_v25  ;;  %s3655_s6 = scalar_lea.vmem %s3701_s3, %s2812_s30 }
  0x11   : > { %v3469_v0 = vld [vmem:[%s221_s19] sm:$0xff]  ;;  %v3471_v1 = vld [vmem:[%s221_s19 + $0x10] sm:$0xff]  ;;  %v237_v2 = vld [vmem:[%s221_s19 + $0x8] sm:$0xff]  ;;  %v3505_v30 = vpack.c.bf16 %v412_v27, %v405_v26 }
  0x12   : > { %260 = vrot.lane.b32.xlu0 %v3469_v0, %s3423_s20  ;;  %264 = vrot.lane.b32.xlu1 %v3471_v1, %s3423_s20  ;;  %v3475_v3 = vld [vmem:[%s221_s19 + $0x18] sm:$0xff]  ;;  %v3507_v31 = vpack.c.bf16 %v1000_v29, %v993_v28 }
  0x13   : > { %3202 = vmatprep.subr.bf16.mxu0 %v3505_v30 }
  0x14   : > { %3226 = vmatprep.subr.bf16.mxu1 %v3507_v31 }
  0x16   : > { %262 = vrot.lane.b32.xlu0 %v237_v2, %s3423_s20  ;;  %266 = vrot.lane.b32.xlu1 %v3475_v3, %s3423_s20 }
  0x1a   : > { %244 = vrot.lane.b32.xlu0 %v3469_v0, %s3424_s29  ;;  %246 = vrot.lane.b32.xlu1 %v237_v2, %s3424_s29 }
  0x1e   : > { %248 = vrot.lane.b32.xlu0 %v3471_v1, %s3424_s29  ;;  %250 = vrot.lane.b32.xlu1 %v3475_v3, %s3424_s29 }
  0x84   : > { %v261_v36 = vpop.permute.xlu0 %260  ;;  %v265_v37 = vpop.permute.xlu1 %264 }
  0x85   : > { %v272_v38 = vsub.f32 %v3469_v0, %v261_v36  ;;  %v274_v39 = vsub.f32 %v3471_v1, %v265_v37 }
  0x87   : > { %1473 = vrot.lane.b32.xlu0 %v272_v38, %s3424_s29 }
  0x88   : > { %v263_v40 = vpop.permute.xlu0 %262  ;;  %v267_v41 = vpop.permute.xlu1 %266 }
  0x89   : > { %v273_v42 = vsub.f32 %v237_v2, %v263_v40  ;;  %v275_v43 = vsub.f32 %v3475_v3, %v267_v41 }
  0x8b   : > { %1477 = vrot.lane.b32.xlu0 %v274_v39, %s3424_s29  ;;  %1475 = vrot.lane.b32.xlu1 %v273_v42, %s3424_s29 }
  0x8c   : > { %v245_v44 = vpop.permute.xlu0 %244  ;;  %v247_v45 = vpop.permute.xlu1 %246 }
  0x8d   : > { %v256_v46 = vadd.f32 %v245_v44, %v3469_v0  ;;  %v257_v47 = vadd.f32 %v247_v45, %v237_v2 }
  0x8f   : > { %1479 = vrot.lane.b32.xlu1 %v275_v43, %s3424_s29  ;;  %v282_v48 = vsel %vm280_vm0, %v256_v46, 0  ;;  %v285_v49 = vsel %vm280_vm0, %v257_v47, 0 }
  0x90   : > { %v3529_v50 = vand.u32 4294901760, %v282_v48  ;;  %v3531_v51 = vand.u32 4294901760, %v285_v49  ;;  %v249_v52 = vpop.permute.xlu0 %248  ;;  %v251_v53 = vpop.permute.xlu1 %250 }
  0x91   : > { %v258_v54 = vadd.f32 %v249_v52, %v3471_v1  ;;  %v259_v55 = vadd.f32 %v251_v53, %v3475_v3 }
  0x92   : > { %v361_v56 = vsub.f32 %v282_v48, %v3529_v50  ;;  %v371_v57 = vsub.f32 %v285_v49, %v3531_v51 }
  0x93   : > { %v288_v58 = vsel %vm280_vm0, %v258_v54, 0  ;;  %v291_v59 = vsel %vm280_vm0, %v259_v55, 0 }
  0x94   : > { %v3539_v60 = vand.u32 4294901760, %v288_v58  ;;  %v3541_v61 = vand.u32 4294901760, %v291_v59  ;;  %v362_v62 = vand.u32 4294901760, %v361_v56  ;;  %v372_v63 = vand.u32 4294901760, %v371_v57 }
  0x96   : > { %v381_v0 = vsub.f32 %v288_v58, %v3539_v60  ;;  %v391_v1 = vsub.f32 %v291_v59, %v3541_v61  ;;  %v363_v2 = vsub.f32 %v361_v56, %v362_v62  ;;  %v373_v3 = vsub.f32 %v371_v57, %v372_v63 }
  0x98   : > { %v364_v4 = vand.u32 4294901760, %v363_v2  ;;  %v374_v5 = vand.u32 4294901760, %v373_v3  ;;  %v382_v6 = vand.u32 4294901760, %v381_v0  ;;  %v392_v7 = vand.u32 4294901760, %v391_v1 }
  0x9a   : > { %2961 = vmatprep.mubr.f32.mxu0 %v364_v4  ;;  %3021 = vmatprep.mubr.f32.mxu1 %v364_v4  ;;  %v383_v8 = vsub.f32 %v381_v0, %v382_v6  ;;  %v393_v9 = vsub.f32 %v391_v1, %v392_v7 }
  0x9b   : > { %2962 = vmatmul.mubr.f32.vlgmr.msra.gmra.mrb[0].mxu0 %v374_v5  ;;  %3022 = vmatmul.mubr.f32.vlgmr.msra.gmra.mrb[0].mxu1 %v374_v5 }
  0x9c   : > { %v384_v10 = vand.u32 4294901760, %v383_v8  ;;  %v394_v11 = vand.u32 4294901760, %v393_v9  ;;  %3204 = vmatpush3.bf16.msra.mxu0 %v3505_v30  ;;  %3228 = vmatpush3.bf16.msra.mxu1 %v3507_v31 }
  0x9d   : > { %3206 = vmatprep.subr.bf16.mxu0 %v3509_v32  ;;  %3230 = vmatprep.subr.bf16.mxu1 %v3511_v33 }
  0x9e   : > { %2964 = vmatprep.mubr.f32.mxu0 %v384_v10  ;;  %3024 = vmatprep.mubr.f32.mxu1 %v384_v10 }
  0x9f   : > { %2965 = vmatmul.mubr.f32.gmra.mrb[2].mxu0 %v394_v11  ;;  %3025 = vmatmul.mubr.f32.gmra.mrb[2].mxu1 %v394_v11 }
  0xa0   : > { %2971 = vmatprep.mubr.f32.mxu0 %v3529_v50  ;;  %3031 = vmatprep.mubr.f32.mxu1 %v3529_v50 }
  0xa3   : > { %2972 = vmatmul.mubr.f32.vlgmr.msra.gmra.mrb[0].mxu0 %v3531_v51  ;;  %3032 = vmatmul.mubr.f32.vlgmr.msra.gmra.mrb[0].mxu1 %v3531_v51 }
  0xa4   : > { %2974 = vmatprep.mubr.f32.mxu0 %v3539_v60  ;;  %3034 = vmatprep.mubr.f32.mxu1 %v3539_v60 }
  0xa5   : > { %3208 = vmatpush3.bf16.msra.mxu0 %v3509_v32  ;;  %3232 = vmatpush3.bf16.msra.mxu1 %v3511_v33 }
  0xa6   : > { %3210 = vmatprep.subr.bf16.mxu0 %v3490_v12  ;;  %3234 = vmatprep.subr.bf16.mxu1 %v3495_v13 }
  0xa7   : > { %2975 = vmatmul.mubr.f32.gmra.mrb[2].mxu0 %v3541_v61  ;;  %3035 = vmatmul.mubr.f32.gmra.mrb[2].mxu1 %v3541_v61 }
  0xa8   : > { %2981 = vmatprep.mubr.f32.mxu0 %v361_v56  ;;  %3041 = vmatprep.mubr.f32.mxu1 %v361_v56 }
  0xab   : > { %2982 = vmatmul.mubr.f32.vlgmr.msra.gmra.mrb[0].mxu0 %v371_v57  ;;  %3042 = vmatmul.mubr.f32.vlgmr.msra.gmra.mrb[0].mxu1 %v371_v57 }
  0xac   : > { %2984 = vmatprep.mubr.f32.mxu0 %v381_v0  ;;  %3044 = vmatprep.mubr.f32.mxu1 %v381_v0 }
  0xad   : > { %3212 = vmatpush3.bf16.msra.mxu0 %v3490_v12  ;;  %3236 = vmatpush3.bf16.msra.mxu1 %v3495_v13 }
  0xae   : > { %3214 = vmatprep.subr.bf16.mxu0 %v3515_v34  ;;  %3238 = vmatprep.subr.bf16.mxu1 %v3517_v35 }
  0xaf   : > { %2985 = vmatmul.mubr.f32.gmra.mrb[2].mxu0 %v391_v1  ;;  %3045 = vmatmul.mubr.f32.gmra.mrb[2].mxu1 %v391_v1 }
  0xb0   : > { %2991 = vmatprep.mubr.f32.mxu0 %v362_v62  ;;  %3051 = vmatprep.mubr.f32.mxu1 %v362_v62 }
  0xb3   : > { %2992 = vmatmul.mubr.f32.vlgmr.msra.gmra.mrb[0].mxu0 %v372_v63  ;;  %3052 = vmatmul.mubr.f32.vlgmr.msra.gmra.mrb[0].mxu1 %v372_v63 }
  0xb4   : > { %2994 = vmatprep.mubr.f32.mxu0 %v382_v6  ;;  %3054 = vmatprep.mubr.f32.mxu1 %v382_v6 }
  0xb5   : > { %3216 = vmatpush3.bf16.msra.mxu0 %v3515_v34  ;;  %3240 = vmatpush3.bf16.msra.mxu1 %v3517_v35 }
  0xb6   : > { %3218 = vmatprep.subr.bf16.mxu0 %v3490_v12  ;;  %3242 = vmatprep.subr.bf16.mxu1 %v3495_v13 }
  0xb7   : > { %2995 = vmatmul.mubr.f32.gmra.mrb[2].mxu0 %v392_v7  ;;  %3055 = vmatmul.mubr.f32.gmra.mrb[2].mxu1 %v392_v7 }
  0xb8   : > { %3001 = vmatprep.mubr.f32.mxu0 %v3529_v50  ;;  %3061 = vmatprep.mubr.f32.mxu1 %v3529_v50 }
  0xbb   : > { %3002 = vmatmul.mubr.f32.vlgmr.msra.gmra.mrb[0].mxu0 %v3531_v51  ;;  %3062 = vmatmul.mubr.f32.vlgmr.msra.gmra.mrb[0].mxu1 %v3531_v51 }
  0xbc   : > { %3004 = vmatprep.mubr.f32.mxu0 %v3539_v60  ;;  %3064 = vmatprep.mubr.f32.mxu1 %v3539_v60 }
  0xbd   : > { %3220 = vmatpush3.bf16.msra.mxu0 %v3490_v12  ;;  %3244 = vmatpush3.bf16.msra.mxu1 %v3495_v13 }
  0xbe   : > { %3246 = vmatprep.subr.bf16.mxu0 %v3490_v12  ;;  %3270 = vmatprep.subr.bf16.mxu1 %v3495_v13 }
  0xbf   : > { %3005 = vmatmul.mubr.f32.gmra.mrb[2].mxu0 %v3541_v61  ;;  %3065 = vmatmul.mubr.f32.gmra.mrb[2].mxu1 %v3541_v61 }
  0xc0   : > { %3011 = vmatprep.mubr.f32.mxu0 %v3529_v50  ;;  %3071 = vmatprep.mubr.f32.mxu1 %v3529_v50 }
  0xc3   : > { %3012 = vmatmul.mubr.f32.vlgmr.msra.gmra.mrb[0].mxu0 %v3531_v51  ;;  %3072 = vmatmul.mubr.f32.vlgmr.msra.gmra.mrb[0].mxu1 %v3531_v51 }
  0xc4   : > { %3014 = vmatprep.mubr.f32.mxu0 %v3539_v60  ;;  %3074 = vmatprep.mubr.f32.mxu1 %v3539_v60 }
  0xc5   : > { %3248 = vmatpush3.bf16.msra.mxu0 %v3490_v12  ;;  %3272 = vmatpush3.bf16.msra.mxu1 %v3495_v13 }
  0xc6   : > { %3250 = vmatprep.subr.bf16.mxu0 %v3505_v30  ;;  %3274 = vmatprep.subr.bf16.mxu1 %v3507_v31 }
  0xc7   : > { %3015 = vmatmul.mubr.f32.gmra.mrb[2].mxu0 %v3541_v61  ;;  %3075 = vmatmul.mubr.f32.gmra.mrb[2].mxu1 %v3541_v61 }
  0xf9   : > { %v1474_v14 = vpop.permute.xlu0 %1473 }
  0xfa   : > { %v1481_v15 = vsel %vm280_vm0, %v1474_v14, 0 }
  0xfb   : > { %v3594_v16 = vand.u32 4294901760, %v1481_v15 }
  0xfd   : > { %v1557_v17 = vsub.f32 %v1481_v15, %v3594_v16  ;;  %v1476_v18 = vpop.permute.xlu1 %1475  ;;  %v1478_v19 = vpop.permute.xlu0 %1477 }
  0xfe   : > { %v1483_v20 = vsel %vm280_vm0, %v1476_v18, 0  ;;  %v1485_v21 = vsel %vm280_vm0, %v1478_v19, 0 }
  0xff   : > { %v3599_v22 = vand.u32 4294901760, %v1483_v20  ;;  %v3601_v23 = vand.u32 4294901760, %v1485_v21  ;;  %v1558_v24 = vand.u32 4294901760, %v1557_v17 }
 0x101   : > { %v1567_v25 = vsub.f32 %v1483_v20, %v3599_v22  ;;  %v1577_v26 = vsub.f32 %v1485_v21, %v3601_v23  ;;  %v1480_v27 = vpop.permute.xlu1 %1479  ;;  %v1559_v28 = vsub.f32 %v1557_v17, %v1558_v24 }
 0x102   : > { %v1487_v29 = vsel %vm280_vm0, %v1480_v27, 0 }
 0x103   : > { %v1568_v36 = vand.u32 4294901760, %v1567_v25  ;;  %v3606_v37 = vand.u32 4294901760, %v1487_v29  ;;  %v1560_v38 = vand.u32 4294901760, %v1559_v28  ;;  %v1578_v39 = vand.u32 4294901760, %v1577_v26 }
 0x105   : > { %v1569_v40 = vsub.f32 %v1567_v25, %v1568_v36  ;;  %v1587_v41 = vsub.f32 %v1487_v29, %v3606_v37  ;;  %3081 = vmatprep.mubr.f32.mxu0 %v1560_v38  ;;  %3141 = vmatprep.mubr.f32.mxu1 %v1560_v38  ;;  %v1579_v42 = vsub.f32 %v1577_v26, %v1578_v39 }
 0x107   : > { %v1570_v43 = vand.u32 4294901760, %v1569_v40  ;;  %v1580_v44 = vand.u32 4294901760, %v1579_v42  ;;  %v1588_v45 = vand.u32 4294901760, %v1587_v41 }
 0x109   : > { %3082 = vmatmul.mubr.f32.vlgmr.msra.gmra.mrb[4].mxu0 %v1570_v43  ;;  %3142 = vmatmul.mubr.f32.vlgmr.msra.gmra.mrb[4].mxu1 %v1570_v43  ;;  %v1589_v46 = vsub.f32 %v1587_v41, %v1588_v45 }
 0x10a   : > { %3252 = vmatpush3.bf16.msra.mxu0 %v3505_v30  ;;  %3276 = vmatpush3.bf16.msra.mxu1 %v3507_v31 }
 0x10b   : > { %3084 = vmatprep.mubr.f32.mxu0 %v1580_v44  ;;  %3144 = vmatprep.mubr.f32.mxu1 %v1580_v44  ;;  %v1590_v47 = vand.u32 4294901760, %v1589_v46 }
 0x10c   : > { %3254 = vmatprep.subr.bf16.mxu0 %v3509_v32  ;;  %3278 = vmatprep.subr.bf16.mxu1 %v3511_v33 }
 0x10d   : > { %3085 = vmatmul.mubr.f32.gmra.mrb[6].mxu0 %v1590_v47  ;;  %3145 = vmatmul.mubr.f32.gmra.mrb[6].mxu1 %v1590_v47 }
 0x10e   : > { %3091 = vmatprep.mubr.f32.mxu0 %v3594_v16  ;;  %3151 = vmatprep.mubr.f32.mxu1 %v3594_v16 }
 0x111   : > { %3092 = vmatmul.mubr.f32.vlgmr.msra.gmra.mrb[4].mxu0 %v3599_v22  ;;  %3152 = vmatmul.mubr.f32.vlgmr.msra.gmra.mrb[4].mxu1 %v3599_v22 }
 0x112   : > { %3256 = vmatpush3.bf16.msra.mxu0 %v3509_v32  ;;  %3280 = vmatpush3.bf16.msra.mxu1 %v3511_v33 }
 0x113   : > { %3094 = vmatprep.mubr.f32.mxu0 %v3601_v23  ;;  %3154 = vmatprep.mubr.f32.mxu1 %v3601_v23 }
 0x114   : > { %3258 = vmatprep.subr.bf16.mxu0 %v3490_v12  ;;  %3282 = vmatprep.subr.bf16.mxu1 %v3495_v13 }
 0x115   : > { %3095 = vmatmul.mubr.f32.gmra.mrb[6].mxu0 %v3606_v37  ;;  %3155 = vmatmul.mubr.f32.gmra.mrb[6].mxu1 %v3606_v37 }
 0x116   : > { %3101 = vmatprep.mubr.f32.mxu0 %v1557_v17  ;;  %3161 = vmatprep.mubr.f32.mxu1 %v1557_v17 }
 0x119   : > { %3102 = vmatmul.mubr.f32.vlgmr.msra.gmra.mrb[4].mxu0 %v1567_v25  ;;  %3162 = vmatmul.mubr.f32.vlgmr.msra.gmra.mrb[4].mxu1 %v1567_v25 }
 0x11a   : > { %3260 = vmatpush3.bf16.msra.mxu0 %v3490_v12  ;;  %3284 = vmatpush3.bf16.msra.mxu1 %v3495_v13 }
 0x11b   : > { %3104 = vmatprep.mubr.f32.mxu0 %v1577_v26  ;;  %3164 = vmatprep.mubr.f32.mxu1 %v1577_v26 }
 0x11c   : > { %3262 = vmatprep.subr.bf16.mxu0 %v3515_v34  ;;  %3286 = vmatprep.subr.bf16.mxu1 %v3517_v35 }
 0x11d   : > { %3105 = vmatmul.mubr.f32.gmra.mrb[6].mxu0 %v1587_v41  ;;  %3165 = vmatmul.mubr.f32.gmra.mrb[6].mxu1 %v1587_v41 }
 0x11e   : > { %3111 = vmatprep.mubr.f32.mxu0 %v1558_v24  ;;  %3171 = vmatprep.mubr.f32.mxu1 %v1558_v24 }
 0x121   : > { %3112 = vmatmul.mubr.f32.vlgmr.msra.gmra.mrb[4].mxu0 %v1568_v36  ;;  %3172 = vmatmul.mubr.f32.vlgmr.msra.gmra.mrb[4].mxu1 %v1568_v36 }
 0x122   : > { %3264 = vmatpush3.bf16.msra.mxu0 %v3515_v34  ;;  %3288 = vmatpush3.bf16.msra.mxu1 %v3517_v35 }
 0x123   : > { %3114 = vmatprep.mubr.f32.mxu0 %v1578_v39  ;;  %3174 = vmatprep.mubr.f32.mxu1 %v1578_v39 }
 0x124   : > { %3266 = vmatprep.subr.bf16.mxu0 %v3490_v12  ;;  %3290 = vmatprep.subr.bf16.mxu1 %v3495_v13 }
 0x125   : > { %3115 = vmatmul.mubr.f32.gmra.mrb[6].mxu0 %v1588_v45  ;;  %3175 = vmatmul.mubr.f32.gmra.mrb[6].mxu1 %v1588_v45 }
 0x126   : > { %3121 = vmatprep.mubr.f32.mxu0 %v3594_v16  ;;  %3181 = vmatprep.mubr.f32.mxu1 %v3594_v16 }
 0x129   : > { %3122 = vmatmul.mubr.f32.vlgmr.msra.gmra.mrb[4].mxu0 %v3599_v22  ;;  %3182 = vmatmul.mubr.f32.vlgmr.msra.gmra.mrb[4].mxu1 %v3599_v22 }
 0x12a   : > { %3268 = vmatpush3.bf16.msra.mxu0 %v3490_v12  ;;  %3292 = vmatpush3.bf16.msra.mxu1 %v3495_v13 }
 0x12b   : > { %3124 = vmatprep.mubr.f32.mxu0 %v3601_v23  ;;  %3184 = vmatprep.mubr.f32.mxu1 %v3601_v23 }
 0x12d   : > { %3125 = vmatmul.mubr.f32.gmra.mrb[6].mxu0 %v3606_v37  ;;  %3185 = vmatmul.mubr.f32.gmra.mrb[6].mxu1 %v3606_v37 }
 0x12e   : > { %3131 = vmatprep.mubr.f32.mxu0 %v3594_v16  ;;  %3191 = vmatprep.mubr.f32.mxu1 %v3594_v16 }
 0x131   : > { %3132 = vmatmul.mubr.f32.vlgmr.msra.gmra.mrb[4].mxu0 %v3599_v22  ;;  %3192 = vmatmul.mubr.f32.vlgmr.msra.gmra.mrb[4].mxu1 %v3599_v22 }
 0x132   : > { %3134 = vmatprep.mubr.f32.mxu0 %v3601_v23  ;;  %3194 = vmatprep.mubr.f32.mxu1 %v3601_v23 }
 0x135   : > { %3135 = vmatmul.mubr.f32.gmra.mrb[6].mxu0 %v3606_v37  ;;  %3195 = vmatmul.mubr.f32.gmra.mrb[6].mxu1 %v3606_v37 }
 0x196   : > { %v3013_v12 = vpop.f32.mrb[0].mxu0  ;;  %v3073_v13 = vpop.f32.mrb[0].mxu1 }
 0x197   : > { %2667 = vst.msk [vmem:[%s3655_s6 + $0x8] sm:$0xff] %vm2665_vm1, %v3013_v12  ;;  %2798 = vst.msk [vmem:[%s3655_s6 + $0x28] sm:$0xff] %vm2665_vm1, %v3073_v13  ;;  %v859_v30 = vpop.f32.mrb[1].mxu0  ;;  %v1447_v31 = vpop.f32.mrb[1].mxu1 }
 0x198   : > { %2666 = vst.msk [vmem:[%s3655_s6] sm:$0xff] %vm2665_vm1, %v859_v30  ;;  %2797 = vst.msk [vmem:[%s3655_s6 + $0x20] sm:$0xff] %vm2665_vm1, %v1447_v31 }
 0x19a   : > { %v3016_v32 = vpop.f32.mrb[2].mxu0  ;;  %v3076_v33 = vpop.f32.mrb[2].mxu1 }
 0x19b   : > { %2669 = vst.msk [vmem:[%s3655_s6 + $0x18] sm:$0xff] %vm2665_vm1, %v3016_v32  ;;  %2800 = vst.msk [vmem:[%s3655_s6 + $0x38] sm:$0xff] %vm2665_vm1, %v3076_v33  ;;  %v871_v34 = vpop.f32.mrb[3].mxu0  ;;  %v1459_v35 = vpop.f32.mrb[3].mxu1 }
 0x19c   : > { %2668 = vst.msk [vmem:[%s3655_s6 + $0x10] sm:$0xff] %vm2665_vm1, %v871_v34  ;;  %2799 = vst.msk [vmem:[%s3655_s6 + $0x30] sm:$0xff] %vm2665_vm1, %v1459_v35 }
 0x204   : > { %v3133_v48 = vpop.f32.mrb[4].mxu0  ;;  %v3193_v49 = vpop.f32.mrb[4].mxu1 }
 0x205   : > { %2802 = vst.msk [vmem:[%s3655_s6 + $0x48] sm:$0xff] %vm2665_vm1, %v3133_v48  ;;  %2806 = vst.msk [vmem:[%s3655_s6 + $0x68] sm:$0xff] %vm2665_vm1, %v3193_v49  ;;  %v2055_v50 = vpop.f32.mrb[5].mxu0  ;;  %v2643_v51 = vpop.f32.mrb[5].mxu1 }
 0x206   : > { %2801 = vst.msk [vmem:[%s3655_s6 + $0x40] sm:$0xff] %vm2665_vm1, %v2055_v50  ;;  %2805 = vst.msk [vmem:[%s3655_s6 + $0x60] sm:$0xff] %vm2665_vm1, %v2643_v51 }
 0x208   : > { %v3136_v52 = vpop.f32.mrb[6].mxu0  ;;  %v3196_v53 = vpop.f32.mrb[6].mxu1 }
 0x209   : > { %2804 = vst.msk [vmem:[%s3655_s6 + $0x58] sm:$0xff] %vm2665_vm1, %v3136_v52  ;;  %2808 = vst.msk [vmem:[%s3655_s6 + $0x78] sm:$0xff] %vm2665_vm1, %v3196_v53  ;;  %v2067_v54 = vpop.f32.mrb[7].mxu0  ;;  %v2655_v55 = vpop.f32.mrb[7].mxu1 }
 0x20a   : > { %2803 = vst.msk [vmem:[%s3655_s6 + $0x50] sm:$0xff] %vm2665_vm1, %v2067_v54  ;;  %2807 = vst.msk [vmem:[%s3655_s6 + $0x70] sm:$0xff] %vm2665_vm1, %v2655_v55 }
 0x20b PF: > { %s13_s14 = sadd.s32 1, %s3421_s14   ;;  %s3702_s12 = smov %s3417_s13 }
 0x20c   : > { %p10_p5 = scmp.ge.s32.totalorder %s13_s14, 4   ;;  %s3703_s13 = smov %s3705_s15 }
 0x20e   :  { %12 = sbr.rel (!%p10_p5) target bundleno = 2 (0x2), region = 65 }

</bundles_post_ra>
